<compile_context>
chip_gen: v7x
topology: tpu7x:2x2x1
jax: 0.10.0
libtpu: 0.0.40
codegen_flags: <defaults>
</compile_context>

<pallas_src>
import functools
import math

import jax
import jax.numpy as jnp
from jax.experimental import pallas as pl
from jax.experimental.pallas import tpu as pltpu


def _round_up(v: int, m: int) -> int:
    return (v + m - 1) // m * m


# --------------------------------------------------------------------------
# Kernel A: Cin fits in a single K block -> no accumulator, no K grid axis.
# --------------------------------------------------------------------------
def _linear_grad_kernel_noacc(x_ref, j_ref, w_ref, b_ref, y_ref, g_ref):
    w = w_ref[...]
    y_ref[...] = (
        jnp.dot(x_ref[...], w, preferred_element_type=jnp.float32) + b_ref[...]
    ).astype(y_ref.dtype)
    g_ref[...] = jnp.dot(
        j_ref[...], w, preferred_element_type=jnp.float32
    ).astype(g_ref.dtype)


# --------------------------------------------------------------------------
# Kernel B: K-tiled fallback for very large Cin (f32 VMEM accumulators).
# --------------------------------------------------------------------------
def _linear_grad_kernel_acc(
    x_ref, j_ref, w_ref, b_ref, y_ref, g_ref, y_acc, g_acc, *, cin, tk
):
    # Grid indices are read at the top level only (never inside pl.when).
    k = pl.program_id(2)
    k_last = pl.num_programs(2) - 1

    @pl.when(k == 0)
    def _():
        y_acc[...] = jnp.zeros_like(y_acc)
        g_acc[...] = jnp.zeros_like(g_acc)

    x_blk = x_ref[...]
    j_blk = j_ref[...]
    if cin % tk != 0:
        # Last K tile overhangs the real Cin: mask the garbage columns so
        # possible NaN/Inf stale data never contaminates the accumulation.
        col = jax.lax.broadcasted_iota(jnp.int32, (1, tk), 1) + k * tk
        valid = col < cin
        x_blk = jnp.where(valid, x_blk, 0.0)
        j_blk = jnp.where(valid, j_blk, 0.0)

    w = w_ref[...]
    y_acc[...] += jnp.dot(x_blk, w, preferred_element_type=jnp.float32)
    g_acc[...] += jnp.dot(j_blk, w, preferred_element_type=jnp.float32)

    @pl.when(k == k_last)
    def _():
        y_ref[...] = (y_acc[...] + b_ref[...]).astype(y_ref.dtype)
        g_ref[...] = g_acc[...].astype(g_ref.dtype)


# --------------------------------------------------------------------------
# Wrapper
# --------------------------------------------------------------------------
def linear_grad_forward(x, J, weight, bias=None):
    """Pallas implementation of LinearGradFunction.forward.

    Args:
      x:      [B, Cin]       input features
      J:      [B, 3, Cin]    gradients of input features
      weight: [Cin, Cout]    transposed weight (weight_t in the module)
      bias:   [Cout] or None

    Returns:
      (y [B, Cout], G [B, 3, Cout])
    """
    B, Cin = x.shape
    Cin_w, Cout = weight.shape
    assert Cin_w == Cin
    assert J.shape == (B, 3, Cin)
    dtype = x.dtype

    # Contiguous flatten: Jf rows [3b, 3b+3) hold batch b's three gradients,
    # so an M tile of tm batches maps to exactly 3*tm consecutive Jf rows.
    Jf = J.reshape(3 * B, Cin)

    if bias is None:
        bias2d = jnp.zeros((1, Cout), dtype)
    else:
        bias2d = bias.reshape(1, Cout).astype(dtype)

    # ---- tile-size selection ---------------------------------------------
    # N: whole Cout when it fits (single N tile -> weight fetched once);
    #    otherwise 512-wide lane-dense tiles with cdiv edge handling.
    tn = Cout if Cout <= 1024 else 512
    use_k_tiling = Cin > 2048
    tk = 512 if use_k_tiling else Cin

    # M: as large as VMEM comfortably allows (each x row carries 3 J rows).
    tm = min(512, _round_up(B, 8))

    def _footprint(tm_):
        per_step = (
            tm_ * tk          # x block
            + 3 * tm_ * tk    # J block
            + tk * tn         # weight block
            + tn              # bias
            + tm_ * tn        # y block
            + 3 * tm_ * tn    # G block
        )
        acc = (4 * tm_ * tn) if use_k_tiling else 0
        return 4 * (2 * per_step + acc)  # f32, double-buffered in/out

    while tm > 8 and _footprint(tm) > 36 * 1024 * 1024:
        tm = max(8, tm // 2)

    m_tiles = pl.cdiv(B, tm)
    n_tiles = pl.cdiv(Cout, tn)

    cost = pl.CostEstimate(
        flops=2 * 4 * B * Cin * Cout,
        transcendentals=0,
        bytes_accessed=4 * (4 * B * Cin + Cin * Cout + 4 * B * Cout + Cout),
    )
    out_shapes = (
        jax.ShapeDtypeStruct((B, Cout), dtype),
        jax.ShapeDtypeStruct((3 * B, Cout), dtype),
    )
    vmem_limit = 48 * 1024 * 1024  # generous, still < v7x 64 MiB physical

    if not use_k_tiling:
        # Grid (N, M): M innermost so the weight block index (0, j) is
        # unchanged across consecutive steps -> weight stays VMEM-resident.
        y, Gf = pl.pallas_call(
            _linear_grad_kernel_noacc,
            out_shape=out_shapes,
            grid=(n_tiles, m_tiles),
            in_specs=[
                pl.BlockSpec((tm, Cin), lambda j, i: (i, 0)),       # x
                pl.BlockSpec((3 * tm, Cin), lambda j, i: (i, 0)),   # J (flat)
                pl.BlockSpec((Cin, tn), lambda j, i: (0, j)),       # weight
                pl.BlockSpec((1, tn), lambda j, i: (0, j)),         # bias
            ],
            out_specs=(
                pl.BlockSpec((tm, tn), lambda j, i: (i, j)),        # y
                pl.BlockSpec((3 * tm, tn), lambda j, i: (i, j)),    # G (flat)
            ),
            compiler_params=pltpu.CompilerParams(
                dimension_semantics=("parallel", "parallel"),
                vmem_limit_bytes=vmem_limit,
            ),
            cost_estimate=cost,
        )(x, Jf, weight, bias2d)
    else:
        # Rare large-Cin path: K-tiled with accumulators. Zero-pad the
        # (small) weight along K so padded rows contribute exactly zero.
        Cin_p = _round_up(Cin, tk)
        w_p = jnp.zeros((Cin_p, Cout), weight.dtype).at[:Cin, :].set(weight)
        kernel = functools.partial(_linear_grad_kernel_acc, cin=Cin, tk=tk)
        y, Gf = pl.pallas_call(
            kernel,
            out_shape=out_shapes,
            grid=(n_tiles, m_tiles, Cin_p // tk),
            in_specs=[
                pl.BlockSpec((tm, tk), lambda j, i, k: (i, k)),
                pl.BlockSpec((3 * tm, tk), lambda j, i, k: (i, k)),
                pl.BlockSpec((tk, tn), lambda j, i, k: (k, j)),
                pl.BlockSpec((1, tn), lambda j, i, k: (0, j)),
            ],
            out_specs=(
                pl.BlockSpec((tm, tn), lambda j, i, k: (i, j)),
                pl.BlockSpec((3 * tm, tn), lambda j, i, k: (i, j)),
            ),
            scratch_shapes=[
                pltpu.VMEM((tm, tn), jnp.float32),
                pltpu.VMEM((3 * tm, tn), jnp.float32),
            ],
            compiler_params=pltpu.CompilerParams(
                dimension_semantics=("parallel", "parallel", "arbitrary"),
                vmem_limit_bytes=vmem_limit,
            ),
            cost_estimate=cost,
        )(x, Jf, w_p, bias2d)

    G = Gf.reshape(B, 3, Cout)
    return y, G


class LinearGradLayerPallas:
    """JAX/Pallas port of LinearGradLayer (forward-pass semantics only)."""
    # TODO(synk): custom backward (LinearGradFunction.backward) not implemented.

    def __init__(self, input_ch: int = 128, output_ch: int = 128, key=None):
        if key is None:
            key = jax.random.PRNGKey(0)
        self.input_ch = input_ch
        self.output_ch = output_ch
        # xavier_normal_ on [input_ch, output_ch]: std = sqrt(2/(fan_in+fan_out))
        std = math.sqrt(2.0 / (input_ch + output_ch))
        self.weight = std * jax.random.normal(
            key, (input_ch, output_ch), dtype=jnp.float32
        )
        # nn.init.constant_(bias, 0.0)
        self.bias = jnp.zeros((output_ch,), dtype=jnp.float32)
        self._fwd = jax.jit(linear_grad_forward)

    def __call__(self, x, J):
        return self._fwd(x, J, self.weight, self.bias)


if __name__ == "__main__":
    key = jax.random.PRNGKey(0)
    k_w, k_x, k_j = jax.random.split(key, 3)

    batch = 8
    input_ch = 32
    output_ch = 32

    layer = LinearGradLayerPallas(input_ch, output_ch, key=k_w)

    x = jax.random.normal(k_x, (batch, input_ch), dtype=jnp.float32)
    J = jax.random.normal(k_j, (batch, 3, input_ch), dtype=jnp.float32)

    y, G = layer(x, J)
    jax.block_until_ready((y, G))

    # reference check in plain JAX
    y_ref = x @ layer.weight + layer.bias[None, :]
    G_ref = jnp.einsum("bki,io->bko", J, layer.weight)
    assert y.shape == (batch, output_ch)
    assert G.shape == (batch, 3, output_ch)
    assert jnp.allclose(y, y_ref, atol=1e-5, rtol=1e-5)
    assert jnp.allclose(G, G_ref, atol=1e-5, rtol=1e-5)

    print("KERNEL_OK")
</pallas_src>

<mosaic_0001>
module attributes {stable_mosaic.version = 11 : i64} {
  func.func @_linear_grad_kernel_noacc(%arg0: i32, %arg1: i32, %arg2: memref<8x32xf32, #tpu.memory_space<vmem>>, %arg3: memref<24x32xf32, #tpu.memory_space<vmem>>, %arg4: memref<32x32xf32, #tpu.memory_space<vmem>>, %arg5: memref<1x32xf32, #tpu.memory_space<vmem>>, %arg6: memref<8x32xf32, #tpu.memory_space<vmem>>, %arg7: memref<24x32xf32, #tpu.memory_space<vmem>>) attributes {dimension_semantics = [#tpu.dimension_semantics<parallel>, #tpu.dimension_semantics<parallel>], iteration_bounds = array<i64: 1, 1>, scalar_prefetch = 0 : i64, scratch_operands = 0 : i64, tpu.core_type = #tpu.core_type<tc>, window_params = [{transform_indices = @transform_0, window_bounds = array<i64: 8, 32>}, {transform_indices = @transform_1, window_bounds = array<i64: 24, 32>}, {transform_indices = @transform_2, window_bounds = array<i64: 32, 32>}, {transform_indices = @transform_3, window_bounds = array<i64: 1, 32>}, {transform_indices = @transform_4, window_bounds = array<i64: 8, 32>}, {transform_indices = @transform_5, window_bounds = array<i64: 24, 32>}]} {
    %c0 = arith.constant 0 : index
    %c0_0 = arith.constant 0 : index
    %0 = vector.load %arg4[%c0, %c0_0] : memref<32x32xf32, #tpu.memory_space<vmem>>, vector<32x32xf32>
    %c0_1 = arith.constant 0 : index
    %c0_2 = arith.constant 0 : index
    %1 = vector.load %arg2[%c0_1, %c0_2] : memref<8x32xf32, #tpu.memory_space<vmem>>, vector<8x32xf32>
    %cst = arith.constant dense<0.000000e+00> : vector<8x32xf32>
    %2 = tpu.matmul %1, %0, %cst {dimension_numbers = #tpu.dot_dimension_numbers<[1], [0], [0], [1], [0, 0, 1, 1], [], []>} : vector<8x32xf32>, vector<32x32xf32>, vector<8x32xf32> -> vector<8x32xf32>
    %c0_3 = arith.constant 0 : index
    %c0_4 = arith.constant 0 : index
    %3 = vector.load %arg5[%c0_3, %c0_4] : memref<1x32xf32, #tpu.memory_space<vmem>>, vector<1x32xf32>
    %4 = vector.broadcast %3 : vector<1x32xf32> to vector<8x32xf32>
    %5 = arith.addf %2, %4 : vector<8x32xf32>
    %c0_5 = arith.constant 0 : index
    %c0_6 = arith.constant 0 : index
    %6 = vector.load %arg6[%c0_5, %c0_6] : memref<8x32xf32, #tpu.memory_space<vmem>>, vector<8x32xf32>
    tpu.vector_store %arg6[%c0_5, %c0_6], %5 {strides = array<i32>} : memref<8x32xf32, #tpu.memory_space<vmem>>, vector<8x32xf32>,
    %c0_7 = arith.constant 0 : index
    %c0_8 = arith.constant 0 : index
    %7 = vector.load %arg3[%c0_7, %c0_8] : memref<24x32xf32, #tpu.memory_space<vmem>>, vector<24x32xf32>
    %cst_9 = arith.constant dense<0.000000e+00> : vector<24x32xf32>
    %8 = tpu.matmul %7, %0, %cst_9 {dimension_numbers = #tpu.dot_dimension_numbers<[1], [0], [0], [1], [0, 0, 1, 1], [], []>} : vector<24x32xf32>, vector<32x32xf32>, vector<24x32xf32> -> vector<24x32xf32>
    %c0_10 = arith.constant 0 : index
    %c0_11 = arith.constant 0 : index
    %9 = vector.load %arg7[%c0_10, %c0_11] : memref<24x32xf32, #tpu.memory_space<vmem>>, vector<24x32xf32>
    tpu.vector_store %arg7[%c0_10, %c0_11], %8 {strides = array<i32>} : memref<24x32xf32, #tpu.memory_space<vmem>>, vector<24x32xf32>,
    return
  }
  func.func @transform_0(%arg0: i32, %arg1: i32) -> (i32, i32) {
    %c0_i32 = arith.constant 0 : i32
    %c0_i32_0 = arith.constant 0 : i32
    return %arg1, %c0_i32 : i32, i32
  }
  func.func @transform_1(%arg0: i32, %arg1: i32) -> (i32, i32) {
    %c0_i32 = arith.constant 0 : i32
    %c0_i32_0 = arith.constant 0 : i32
    return %arg1, %c0_i32 : i32, i32
  }
  func.func @transform_2(%arg0: i32, %arg1: i32) -> (i32, i32) {
    %c0_i32 = arith.constant 0 : i32
    %c0_i32_0 = arith.constant 0 : i32
    return %c0_i32, %arg0 : i32, i32
  }
  func.func @transform_3(%arg0: i32, %arg1: i32) -> (i32, i32) {
    %c0_i32 = arith.constant 0 : i32
    %c0_i32_0 = arith.constant 0 : i32
    return %c0_i32, %arg0 : i32, i32
  }
  func.func @transform_4(%arg0: i32, %arg1: i32) -> (i32, i32) {
    %c0_i32 = arith.constant 0 : i32
    return %arg1, %arg0 : i32, i32
  }
  func.func @transform_5(%arg0: i32, %arg1: i32) -> (i32, i32) {
    %c0_i32 = arith.constant 0 : i32
    return %arg1, %arg0 : i32, i32
  }
}

</mosaic_0001>

<bundles_post_ra>
// kernel: linear_grad_forward.1
= control target key start
LH: loop header
LB: loop body
LE: loop exit
PB: predicated region body
PF: predicated region fallthrough
CT: control target
= control target key end

     0   :  { %v305_v3 = vmov 0.0|0.0   ;;  %vm306_vm0 = vmmov 0   ;;  %v307_v6 = vmov 0.0   ;;  %s399_s0 = inlined_call_operand.vmem [shape: f32[8,32], index: 0, kind: input, shape index: {}]   ;;  %s400_s1 = inlined_call_operand.vmem [shape: f32[24,32], index: 1, kind: input, shape index: {}]   ;;  %s401_s2 = inlined_call_operand.vmem [shape: f32[32,32], index: 2, kind: input, shape index: {}]   ;;  %s402_s3 = inlined_call_operand.vmem [shape: f32[1,32], index: 3, kind: input, shape index: {}]   ;;  %s403_s4 = inlined_call_operand.hbm [shape: f32[8,32], index: 4, kind: output, shape index: {0}]   ;;  %s404_s5 = inlined_call_operand.vmem [shape: f32[24,32], index: 5, kind: output, shape index: {1}]  }
   0x1   :  { %v20_v0 = vld [vmem:[%s401_s2] sm:$0xff]  ;;  %v21_v1 = vld [vmem:[%s401_s2 + $0x8] sm:$0xff]  ;;  %v22_v2 = vld [vmem:[%s401_s2 + $0x10] sm:$0xff]  ;;  %271 = vmatprep.subr.bf16.mxu1 %v305_v3  ;;  %265 = vmatprep.subr.bf16.mxu0 %v305_v3 }
   0x2   :  { %v266_v4 = vpack.c.bf16 %v21_v1, %v20_v0  ;;  %v23_v5 = vld [vmem:[%s401_s2 + $0x18] sm:$0xff]  ;;  %256 = vmatprep.mubr.msk.f32.mxu1 %vm306_vm0, %v307_v6  ;;  %245 = vmatprep.mubr.msk.f32.mxu0 %vm306_vm0, %v307_v6 }
   0x3   :  { %11 = vsyncpa [#allocation3], 0  ;;  %v269_v7 = vpack.c.bf16 %v23_v5, %v22_v2  ;;  %vm32_vm1 = vcmask 261120   ;;  %v107_v8 = vld [vmem:[%s400_s1] sm:$0xff]  ;;  %v108_v10 = vld [vmem:[%s400_s1 + $0x8] sm:$0xff]  ;;  %s308_s9 = smov [#allocation2]  }
   0x4   :  { %273 = vmatpush3.bf16.msra.mxu1 %v266_v4  ;;  %267 = vmatpush3.bf16.msra.mxu0 %v266_v4  ;;  %v24_v9 = vld [vmem:[%s399_s0] sm:$0xff]  ;;  %v109_v11 = vld [vmem:[%s400_s1 + $0x10] sm:$0xff]  ;;  %s208_s10 = sshll.u32 %s308_s9, 4  ;;  %s209_s10 = int_to_ptr.vmem [resolvable:$true] %s208_s10 }
   0x5   :  { %274 = vmatprep.subr.bf16.mxu1 %v305_v3  ;;  %268 = vmatprep.subr.bf16.mxu0 %v305_v3  ;;  %v220_v12 = vld [vmem:[%s402_s3] ss:$0 sm:$0xff]  ;;  %s281_s1 = scalar_lea.vmem %s209_s10, 128  ;;  %p286_p1 = scmp.lt.s32.totalorder %s209_s10, %s209_s10 }
   0x6   :  { %p282_p0 = scmp.ne.s32.totalorder %s209_s10, %s281_s1  ;;  %p287_p2 = scmp.lt.s32.totalorder %s281_s1, %s281_s1 }
   0x8   :  { %276 = vmatpush3.bf16.msra.mxu1 %v269_v7  ;;  %270 = vmatpush3.bf16.msra.mxu0 %v269_v7  ;;  %p288_p3 = por %p287_p2, %p286_p1 }
   0xa   :  { %p289_p4 = pnand %p288_p3, %p282_p0 }
   0xb   :  { %257 = vmatmul.mubr.msk.f32.vlgmr.msra.gmra.mrb[0].mxu1 %vm32_vm1, %v107_v8  ;;  %246 = vmatmul.mubr.msk.f32.vlgmr.msra.gmra.mrb[0].mxu0 %vm32_vm1, %v24_v9 }
   0xc   :  { %259 = vmatprep.mubr.msk.f32.mxu1 %vm306_vm0, %v307_v6 }
   0xf   :  { %260 = vmatmul.mubr.msk.f32.gmra.mrb[2].mxu1 %vm32_vm1, %v108_v10 }
  0x10   :  { %262 = vmatprep.mubr.msk.f32.mxu1 %vm306_vm0, %v307_v6 }
  0x13   :  { %263 = vmatmul.mubr.msk.f32.gmra.mrb[4].mxu1 %vm32_vm1, %v109_v11 }
  0xde   :  { %v185_v13 = vpop.f32.mrb[0].mxu1  ;;  %v102_v14 = vpop.f32.mrb[0].mxu0 }
  0xdf   :  { %199 = vst.msk [vmem:[%s404_s5] sm:$0xff] %vm32_vm1, %v185_v13  ;;  %v258_v15 = vpop.f32.mrb[1].mxu1  ;;  %v103_v16 = vadd.f32 %v220_v12, %v102_v14  ;;  %v247_v17 = vpop.f32.mrb[1].mxu0 }
  0xe1   :  { %106 = vst.msk [vmem:[#allocation2] sm:$0xff] %vm32_vm1, %v103_v16 }
  0xe2   :  { %v190_v18 = vpop.f32.mrb[2].mxu1 }
  0xe3   :  { %292 = shalt.err (!%p289_p4)
}
  0xe4   :  { %s293_s14 = scalar_lea.hbm %s403_s4, 128 }
  0xe5   :  { %p294_p5 = scmp.ne.s32.totalorder %s403_s4, %s293_s14  ;;  %p297_p6 = scmp.lt.u32.totalorder %s293_s14, %s403_s4 }
  0xe7   :  { %p299_p7 = pnand %p297_p6, %p294_p5 }
  0xe9   :  { %302 = shalt.err (!%p299_p7)
}
  0xea   :  { %211 = dma.vmem_to_hbm [thread:$0]  %s209_s10, 128, %s403_s4, [#allocation3]   ;;  %200 = vst.msk [vmem:[%s404_s5 + $0x8] sm:$0xff] %vm32_vm1, %v190_v18  ;;  %v261_v19 = vpop.f32.mrb[3].mxu1 }
  0xeb   :  { %v195_v20 = vpop.f32.mrb[4].mxu1 }
  0xec   :  { %201 = vst.msk [vmem:[%s404_s5 + $0x10] sm:$0xff] %vm32_vm1, %v195_v20  ;;  %v264_v21 = vpop.f32.mrb[5].mxu1 }
  0xed   :  { %303 = dma.done.wait [#allocation3], 128  }
  0xee   :  { %304 = vsyncadd [#allocation3], 4294967168 }
  0xef   :  { %219 = vsyncpa [#allocation3], 1 }

</bundles_post_ra>
